<compile_context>
chip_gen: v7x
topology: tpu7x:2x2x1
jax: 0.10.0
libtpu: 0.0.40
codegen_flags: <defaults>
</compile_context>

<pallas_src>
import functools

import jax
import jax.numpy as jnp
import numpy as np
from jax.experimental import pallas as pl
from jax.experimental.pallas import tpu as pltpu


# --------------------------------------------------------------------------
# Fused kernel
# --------------------------------------------------------------------------
def _total_loss_kernel(labels_ref, reg_ref, cls_ref, feat_ref, out_ref,
                       *, margin, n_feat, batch):
    f32 = jnp.float32
    B = batch
    KB = n_feat * B

    labels = labels_ref[...]                          # (B, 1) int32
    m0 = (labels == 0).astype(f32)                    # row masks built in-kernel
    m1 = (labels == 1).astype(f32)
    n0 = jnp.sum(m0)
    n1 = jnp.sum(m1)

    # ---------------- regression: masked MSE against zeros ----------------
    reg = reg_ref[...].astype(f32)                    # (3B, Dreg), upcast post-DMA
    d_reg = float(reg_ref.shape[-1])
    rowsq = jnp.sum(reg * reg, axis=-1, keepdims=True)   # (3B, 1): lane-reduce first,
    s_a = jnp.sum(rowsq[0 * B:1 * B] * m0)               # then (B,1) mask, no broadcast
    s_p = jnp.sum(rowsq[1 * B:2 * B] * m0)
    s_n = jnp.sum(rowsq[2 * B:3 * B] * m1)
    # empty subsets -> NaN in torch -> replaced by 0 in the reference forward.
    reg_loss = (jnp.where(n1 > 0, s_n / jnp.maximum(n1 * d_reg, 1.0), 0.0)
                + jnp.where(n0 > 0, (s_a + s_p) / jnp.maximum(n0 * d_reg, 1.0), 0.0))

    # ----- classification: 2-class logsumexp on the whole (3B, 2) slab -----
    z = cls_ref[...].astype(f32)                      # (3B, NC)
    z0 = z[:, 0:1]
    z1 = z[:, 1:2]
    if cls_ref.shape[-1] == 2:
        # VPU/EUP only: no XLU row-reduce across a 2-lane-wide tensor.
        lse = jnp.maximum(z0, z1) + jnp.log1p(jnp.exp(-jnp.abs(z0 - z1)))
    else:
        zmax = jnp.max(z, axis=-1, keepdims=True)
        lse = zmax + jnp.log(jnp.sum(jnp.exp(z - zmax), axis=-1, keepdims=True))
    ce0 = lse - z0                                    # CE vs target 0, per row
    ce1 = lse - z1                                    # CE vs target 1, per row
    # rows [0:B] = anchor, [B:2B] = positive (target 0 on m0, 1 on m1),
    # rows [2B:3B] = negative (targets swapped).
    s0 = jnp.sum((ce0[0 * B:1 * B] + ce0[1 * B:2 * B] + ce1[2 * B:3 * B]) * m0)
    s1 = jnp.sum((ce1[0 * B:1 * B] + ce1[1 * B:2 * B] + ce0[2 * B:3 * B]) * m1)
    # empty subset -> NaN CE in torch -> skipped by the reference loop -> 0 here.
    cla_loss = (jnp.where(n0 > 0, s0 / jnp.maximum(n0, 1.0), 0.0)
                + jnp.where(n1 > 0, s1 / jnp.maximum(n1, 1.0), 0.0))

    # --------------- triplet: renorm + hard mining + hinge ----------------
    feats = feat_ref[...].astype(f32)                 # (3*K*B, D)
    sq = jnp.sum(feats * feats, axis=-1, keepdims=True)
    # torch.renorm(2, 0, 1e-5).mul(1e5): rows with ||x|| > 1e-5 scaled by
    # ~1/||x|| (single rsqrt on the EUP); others by 1e5.  The reference's +1e-7
    # epsilon is dropped (relative effect ~1e-8 at these norms).
    inv = jax.lax.rsqrt(sq)
    fr = feats * jnp.where(sq > 1e-10, inv, f32(1e5))
    a = fr[0 * KB:1 * KB]                             # (K*B, D) per branch
    p = fr[1 * KB:2 * KB]
    n = fr[2 * KB:3 * KB]
    d_ap = jnp.sqrt(jnp.sum((a - p) * (a - p), axis=-1, keepdims=True))   # (K*B, 1)
    d_an = jnp.sqrt(jnp.sum((a - n) * (a - n), axis=-1, keepdims=True))
    diff = d_ap - d_an
    sel = (diff < margin).astype(f32)                 # hard-sample mining
    num = jnp.maximum(diff + margin, 0.0) * sel       # hinge on mined rows
    ratios = []
    for k in range(n_feat):                           # static, sublane-aligned slices
        lo, hi = k * B, (k + 1) * B
        # mean over the mined subset (NaN if empty, matching torch mean of empty).
        ratios.append(jnp.sum(num[lo:hi]) / jnp.sum(sel[lo:hi]))
    trip_loss = ratios[0]
    for r in ratios[1:]:
        trip_loss = trip_loss + r

    out_ref[0, 0] = cla_loss + trip_loss + reg_loss


# --------------------------------------------------------------------------
# Wrapper: single fused pallas_call, 4 operands
# --------------------------------------------------------------------------
def total_loss(regression, classification, feat, labels, margin=1.0):
    reg_a, reg_p, reg_n = regression
    cls_a, cls_p, cls_n = classification
    feat_a, feat_p, feat_n = feat
    B = reg_a.shape[0]
    K = len(feat_a)

    labels2d = jnp.asarray(labels).reshape(B, 1).astype(jnp.int32)

    def flat(x):
        # row-major flatten (B, C, H, W) -> (B, C*H*W); MSE is orderless so exact.
        # No dtype cast here: the kernel upcasts after the DMA.
        return x.reshape(B, -1)

    # Slab packing (tens of KiB here -> one cheap HBM copy, 10 DMAs -> 4).
    # TODO(synk): at production sizes keep the big regression maps as separate
    # operands (avoid the wrapper-side concatenate copy) and tile the (B, C*H*W)
    # reduction with a grid over the feature axis ("arbitrary" reduction axis +
    # pl.when accumulator, blocks sized for v7x's 32 MiB scoped / 64 MiB physical
    # VMEM and v5e's 16 MiB default, "parallel" axis for v7x's 2 TCs).
    reg_slab = jnp.concatenate([flat(reg_a), flat(reg_p), flat(reg_n)], axis=0)   # (3B, Dreg)
    cls_slab = jnp.concatenate([cls_a, cls_p, cls_n], axis=0)                     # (3B, NC)
    feat_slab = jnp.concatenate(
        [flat(t) for t in (*feat_a, *feat_p, *feat_n)], axis=0)                   # (3*K*B, D)

    kernel = functools.partial(_total_loss_kernel,
                               margin=float(margin), n_feat=K, batch=B)
    vmem = pl.BlockSpec(memory_space=pltpu.MemorySpace.VMEM)

    out = pl.pallas_call(
        kernel,
        out_shape=jax.ShapeDtypeStruct((1, 1), jnp.float32),
        in_specs=[vmem] * 4,
        out_specs=pl.BlockSpec(memory_space=pltpu.MemorySpace.SMEM),
    )(labels2d, reg_slab, cls_slab, feat_slab)
    return out[0, 0]


# --------------------------------------------------------------------------
# Pure-numpy reference (mirrors the PyTorch forward, float64)
# --------------------------------------------------------------------------
def _np_reference(regression, classification, feat, labels, margin=1.0):
    reg_a, reg_p, reg_n = [np.asarray(t, np.float64) for t in regression]
    cls_a, cls_p, cls_n = [np.asarray(t, np.float64) for t in classification]
    feat_a, feat_p, feat_n = feat
    labels = np.asarray(labels)
    B = reg_a.shape[0]
    mask0, mask1 = labels == 0, labels == 1

    def mse(x):
        return np.mean(x ** 2) if x.size else np.nan

    r1 = mse(reg_n[mask1].reshape(-1))
    r2 = mse(reg_a[mask0].reshape(-1)) + mse(reg_p[mask0].reshape(-1))
    r1 = 0.0 if np.isnan(r1) else r1
    r2 = 0.0 if np.isnan(r2) else r2
    reg_loss = r1 + r2

    def ce(logits, target):
        if logits.shape[0] == 0:
            return np.nan
        z = logits - logits.max(axis=1, keepdims=True)
        logp = z - np.log(np.exp(z).sum(axis=1, keepdims=True))
        return -logp[:, target].mean()

    terms = [ce(cls_a[mask0], 0), ce(cls_a[mask1], 1),
             ce(cls_p[mask0], 0), ce(cls_p[mask1], 1),
             ce(cls_n[mask0], 1), ce(cls_n[mask1], 0)]
    cla_loss = sum(t for t in terms if not np.isnan(t))

    def renorm(x):
        n = np.linalg.norm(x, axis=1, keepdims=True)
        scale = np.where(n > 1e-5, 1e-5 / (n + 1e-7), 1.0)
        return x * scale * 1e5

    def trip(a, p, n):
        a = renorm(np.asarray(a, np.float64).reshape(B, -1))
        p = renorm(np.asarray(p, np.float64).reshape(B, -1))
        n = renorm(np.asarray(n, np.float64).reshape(B, -1))
        d_ap = np.linalg.norm(a - p, axis=1)
        d_an = np.linalg.norm(a - n, axis=1)
        idx = (d_ap - d_an) < margin
        return np.clip(d_ap[idx] - d_an[idx] + margin, 0.0, None).mean()

    trip_loss = sum(trip(a, p, n) for a, p, n in zip(feat_a, feat_p, feat_n))
    return cla_loss + trip_loss + reg_loss


# --------------------------------------------------------------------------
if __name__ == "__main__":
    key = jax.random.PRNGKey(0)
    ks = jax.random.split(key, 16)

    B, C, H, W = 8, 4, 8, 8       # regression maps (NCHW in torch)
    NC = 2                        # classification logits
    D = 32                        # feature embedding dim
    K = 2                         # number of feature tensors per branch
    margin = 1.0

    regression = tuple(
        0.1 * jax.random.normal(ks[i], (B, C, H, W), jnp.float32) for i in range(3))
    classification = tuple(
        jax.random.normal(ks[3 + i], (B, NC), jnp.float32) for i in range(3))
    feat_anchor = [jax.random.normal(ks[6 + i], (B, D), jnp.float32) for i in range(K)]
    feat_positive = [jax.random.normal(ks[8 + i], (B, D), jnp.float32) for i in range(K)]
    feat_negative = [jax.random.normal(ks[10 + i], (B, D), jnp.float32) for i in range(K)]
    labels = jnp.array([0, 1, 0, 1, 1, 0, 0, 1], dtype=jnp.int32)

    run = jax.jit(functools.partial(total_loss, margin=margin))
    out = run(regression, classification,
              (feat_anchor, feat_positive, feat_negative), labels)
    out = jax.block_until_ready(out)

    ref = _np_reference(regression, classification,
                        (feat_anchor, feat_positive, feat_negative),
                        labels, margin=margin)
    np.testing.assert_allclose(np.asarray(out, np.float64), ref,
                               rtol=2e-3, atol=2e-3)
    print("KERNEL_OK")
</pallas_src>

<mosaic_0001>
module attributes {stable_mosaic.version = 11 : i64} {
  func.func @_total_loss_kernel(%arg0: memref<8x1xi32, #tpu.memory_space<vmem>>, %arg1: memref<24x256xf32, #tpu.memory_space<vmem>>, %arg2: memref<24x2xf32, #tpu.memory_space<vmem>>, %arg3: memref<48x32xf32, #tpu.memory_space<vmem>>, %arg4: memref<1x1xf32, #tpu.memory_space<smem>>) attributes {dimension_semantics = [], scalar_prefetch = 0 : i64, scratch_operands = 0 : i64, tpu.core_type = #tpu.core_type<tc>} {
    %c0 = arith.constant 0 : index
    %c0_0 = arith.constant 0 : index
    %0 = vector.load %arg0[%c0, %c0_0] : memref<8x1xi32, #tpu.memory_space<vmem>>, vector<8x1xi32>
    %c0_i32 = arith.constant 0 : i32
    %1 = vector.broadcast %c0_i32 : i32 to vector<8x1xi32>
    %2 = arith.cmpi eq, %0, %1 : vector<8x1xi32>
    %3 = arith.extui %2 : vector<8x1xi1> to vector<8x1xi32>
    %4 = arith.sitofp %3 : vector<8x1xi32> to vector<8x1xf32>
    %c1_i32 = arith.constant 1 : i32
    %5 = vector.broadcast %c1_i32 : i32 to vector<8x1xi32>
    %6 = arith.cmpi eq, %0, %5 : vector<8x1xi32>
    %7 = arith.extui %6 : vector<8x1xi1> to vector<8x1xi32>
    %8 = arith.sitofp %7 : vector<8x1xi32> to vector<8x1xf32>
    %9 = vector.shape_cast %4 : vector<8x1xf32> to vector<1x8x1xf32>
    %cst = arith.constant dense<0.000000e+00> : vector<1xf32>
    %10 = vector.multi_reduction <add>, %9, %cst [1, 2] : vector<1x8x1xf32> to vector<1xf32>
    %11 = vector.shape_cast %10 : vector<1xf32> to vector<1x1x1xf32>
    %12 = vector.extract %11[0, 0, 0] : f32 from vector<1x1x1xf32>
    %13 = vector.shape_cast %8 : vector<8x1xf32> to vector<1x8x1xf32>
    %cst_1 = arith.constant dense<0.000000e+00> : vector<1xf32>
    %14 = vector.multi_reduction <add>, %13, %cst_1 [1, 2] : vector<1x8x1xf32> to vector<1xf32>
    %15 = vector.shape_cast %14 : vector<1xf32> to vector<1x1x1xf32>
    %16 = vector.extract %15[0, 0, 0] : f32 from vector<1x1x1xf32>
    %c0_2 = arith.constant 0 : index
    %c0_3 = arith.constant 0 : index
    %17 = vector.load %arg1[%c0_2, %c0_3] : memref<24x256xf32, #tpu.memory_space<vmem>>, vector<24x256xf32>
    %18 = arith.mulf %17, %17 : vector<24x256xf32>
    %cst_4 = arith.constant dense<0.000000e+00> : vector<24xf32>
    %19 = vector.multi_reduction <add>, %18, %cst_4 [1] : vector<24x256xf32> to vector<24xf32>
    %20 = vector.shape_cast %19 : vector<24xf32> to vector<24x1xf32>
    %21 = vector.extract_strided_slice %20 {offsets = [0, 0], sizes = [8, 1], strides = [1, 1]} : vector<24x1xf32> to vector<8x1xf32>
    %22 = arith.mulf %21, %4 : vector<8x1xf32>
    %23 = vector.shape_cast %22 : vector<8x1xf32> to vector<1x8x1xf32>
    %cst_5 = arith.constant dense<0.000000e+00> : vector<1xf32>
    %24 = vector.multi_reduction <add>, %23, %cst_5 [1, 2] : vector<1x8x1xf32> to vector<1xf32>
    %25 = vector.shape_cast %24 : vector<1xf32> to vector<1x1x1xf32>
    %26 = vector.extract %25[0, 0, 0] : f32 from vector<1x1x1xf32>
    %27 = vector.extract_strided_slice %20 {offsets = [8, 0], sizes = [8, 1], strides = [1, 1]} : vector<24x1xf32> to vector<8x1xf32>
    %28 = arith.mulf %27, %4 : vector<8x1xf32>
    %29 = vector.shape_cast %28 : vector<8x1xf32> to vector<1x8x1xf32>
    %cst_6 = arith.constant dense<0.000000e+00> : vector<1xf32>
    %30 = vector.multi_reduction <add>, %29, %cst_6 [1, 2] : vector<1x8x1xf32> to vector<1xf32>
    %31 = vector.shape_cast %30 : vector<1xf32> to vector<1x1x1xf32>
    %32 = vector.extract %31[0, 0, 0] : f32 from vector<1x1x1xf32>
    %33 = vector.extract_strided_slice %20 {offsets = [16, 0], sizes = [8, 1], strides = [1, 1]} : vector<24x1xf32> to vector<8x1xf32>
    %34 = arith.mulf %33, %8 : vector<8x1xf32>
    %35 = vector.shape_cast %34 : vector<8x1xf32> to vector<1x8x1xf32>
    %cst_7 = arith.constant dense<0.000000e+00> : vector<1xf32>
    %36 = vector.multi_reduction <add>, %35, %cst_7 [1, 2] : vector<1x8x1xf32> to vector<1xf32>
    %37 = vector.shape_cast %36 : vector<1xf32> to vector<1x1x1xf32>
    %38 = vector.extract %37[0, 0, 0] : f32 from vector<1x1x1xf32>
    %cst_8 = arith.constant 0.000000e+00 : f32
    %39 = arith.cmpf ogt, %16, %cst_8 : f32
    %cst_9 = arith.constant 2.560000e+02 : f32
    %40 = arith.mulf %16, %cst_9 : f32
    %cst_10 = arith.constant 1.000000e+00 : f32
    %41 = arith.maximumf %40, %cst_10 : f32
    %42 = arith.divf %38, %41 : f32
    %cst_11 = arith.constant 0.000000e+00 : f32
    %43 = arith.select %39, %42, %cst_11 : f32
    %cst_12 = arith.constant 0.000000e+00 : f32
    %44 = arith.cmpf ogt, %12, %cst_12 : f32
    %45 = arith.addf %26, %32 : f32
    %cst_13 = arith.constant 2.560000e+02 : f32
    %46 = arith.mulf %12, %cst_13 : f32
    %cst_14 = arith.constant 1.000000e+00 : f32
    %47 = arith.maximumf %46, %cst_14 : f32
    %48 = arith.divf %45, %47 : f32
    %cst_15 = arith.constant 0.000000e+00 : f32
    %49 = arith.select %44, %48, %cst_15 : f32
    %50 = arith.addf %43, %49 : f32
    %c0_16 = arith.constant 0 : index
    %c0_17 = arith.constant 0 : index
    %51 = vector.load %arg2[%c0_16, %c0_17] : memref<24x2xf32, #tpu.memory_space<vmem>>, vector<24x2xf32>
    %52 = vector.extract_strided_slice %51 {offsets = [0, 0], sizes = [24, 1], strides = [1, 1]} : vector<24x2xf32> to vector<24x1xf32>
    %53 = vector.extract_strided_slice %51 {offsets = [0, 1], sizes = [24, 1], strides = [1, 1]} : vector<24x2xf32> to vector<24x1xf32>
    %54 = arith.maximumf %52, %53 : vector<24x1xf32>
    %55 = arith.subf %52, %53 : vector<24x1xf32>
    %56 = math.absf %55 : vector<24x1xf32>
    %cst_18 = arith.constant 0.000000e+00 : f32
    %57 = vector.broadcast %cst_18 : f32 to vector<24x1xf32>
    %58 = arith.subf %57, %56 : vector<24x1xf32>
    %59 = math.exp %58 : vector<24x1xf32>
    %60 = math.log1p %59 : vector<24x1xf32>
    %61 = arith.addf %54, %60 : vector<24x1xf32>
    %62 = arith.subf %61, %52 : vector<24x1xf32>
    %63 = arith.subf %61, %53 : vector<24x1xf32>
    %64 = vector.extract_strided_slice %62 {offsets = [0, 0], sizes = [8, 1], strides = [1, 1]} : vector<24x1xf32> to vector<8x1xf32>
    %65 = vector.extract_strided_slice %62 {offsets = [8, 0], sizes = [8, 1], strides = [1, 1]} : vector<24x1xf32> to vector<8x1xf32>
    %66 = arith.addf %64, %65 : vector<8x1xf32>
    %67 = vector.extract_strided_slice %63 {offsets = [16, 0], sizes = [8, 1], strides = [1, 1]} : vector<24x1xf32> to vector<8x1xf32>
    %68 = arith.addf %66, %67 : vector<8x1xf32>
    %69 = arith.mulf %68, %4 : vector<8x1xf32>
    %70 = vector.shape_cast %69 : vector<8x1xf32> to vector<1x8x1xf32>
    %cst_19 = arith.constant dense<0.000000e+00> : vector<1xf32>
    %71 = vector.multi_reduction <add>, %70, %cst_19 [1, 2] : vector<1x8x1xf32> to vector<1xf32>
    %72 = vector.shape_cast %71 : vector<1xf32> to vector<1x1x1xf32>
    %73 = vector.extract %72[0, 0, 0] : f32 from vector<1x1x1xf32>
    %74 = vector.extract_strided_slice %63 {offsets = [0, 0], sizes = [8, 1], strides = [1, 1]} : vector<24x1xf32> to vector<8x1xf32>
    %75 = vector.extract_strided_slice %63 {offsets = [8, 0], sizes = [8, 1], strides = [1, 1]} : vector<24x1xf32> to vector<8x1xf32>
    %76 = arith.addf %74, %75 : vector<8x1xf32>
    %77 = vector.extract_strided_slice %62 {offsets = [16, 0], sizes = [8, 1], strides = [1, 1]} : vector<24x1xf32> to vector<8x1xf32>
    %78 = arith.addf %76, %77 : vector<8x1xf32>
    %79 = arith.mulf %78, %8 : vector<8x1xf32>
    %80 = vector.shape_cast %79 : vector<8x1xf32> to vector<1x8x1xf32>
    %cst_20 = arith.constant dense<0.000000e+00> : vector<1xf32>
    %81 = vector.multi_reduction <add>, %80, %cst_20 [1, 2] : vector<1x8x1xf32> to vector<1xf32>
    %82 = vector.shape_cast %81 : vector<1xf32> to vector<1x1x1xf32>
    %83 = vector.extract %82[0, 0, 0] : f32 from vector<1x1x1xf32>
    %cst_21 = arith.constant 0.000000e+00 : f32
    %84 = arith.cmpf ogt, %12, %cst_21 : f32
    %cst_22 = arith.constant 1.000000e+00 : f32
    %85 = arith.maximumf %12, %cst_22 : f32
    %86 = arith.divf %73, %85 : f32
    %cst_23 = arith.constant 0.000000e+00 : f32
    %87 = arith.select %84, %86, %cst_23 : f32
    %cst_24 = arith.constant 0.000000e+00 : f32
    %88 = arith.cmpf ogt, %16, %cst_24 : f32
    %cst_25 = arith.constant 1.000000e+00 : f32
    %89 = arith.maximumf %16, %cst_25 : f32
    %90 = arith.divf %83, %89 : f32
    %cst_26 = arith.constant 0.000000e+00 : f32
    %91 = arith.select %88, %90, %cst_26 : f32
    %92 = arith.addf %87, %91 : f32
    %c0_27 = arith.constant 0 : index
    %c0_28 = arith.constant 0 : index
    %93 = vector.load %arg3[%c0_27, %c0_28] : memref<48x32xf32, #tpu.memory_space<vmem>>, vector<48x32xf32>
    %94 = arith.mulf %93, %93 : vector<48x32xf32>
    %cst_29 = arith.constant dense<0.000000e+00> : vector<48xf32>
    %95 = vector.multi_reduction <add>, %94, %cst_29 [1] : vector<48x32xf32> to vector<48xf32>
    %96 = vector.shape_cast %95 : vector<48xf32> to vector<48x1xf32>
    %97 = math.rsqrt %96 : vector<48x1xf32>
    %cst_30 = arith.constant 1.000000e-10 : f32
    %98 = vector.broadcast %cst_30 : f32 to vector<48x1xf32>
    %99 = arith.cmpf ogt, %96, %98 : vector<48x1xf32>
    %cst_31 = arith.constant 1.000000e+05 : f32
    %100 = vector.broadcast %cst_31 : f32 to vector<48x1xf32>
    %101 = arith.select %99, %97, %100 : vector<48x1xi1>, vector<48x1xf32>
    %102 = vector.broadcast %101 : vector<48x1xf32> to vector<48x32xf32>
    %103 = arith.mulf %93, %102 : vector<48x32xf32>
    %104 = vector.extract_strided_slice %103 {offsets = [0, 0], sizes = [16, 32], strides = [1, 1]} : vector<48x32xf32> to vector<16x32xf32>
    %105 = vector.extract_strided_slice %103 {offsets = [16, 0], sizes = [16, 32], strides = [1, 1]} : vector<48x32xf32> to vector<16x32xf32>
    %106 = vector.extract_strided_slice %103 {offsets = [32, 0], sizes = [16, 32], strides = [1, 1]} : vector<48x32xf32> to vector<16x32xf32>
    %107 = arith.subf %104, %105 : vector<16x32xf32>
    %108 = arith.subf %104, %105 : vector<16x32xf32>
    %109 = arith.mulf %107, %108 : vector<16x32xf32>
    %cst_32 = arith.constant dense<0.000000e+00> : vector<16xf32>
    %110 = vector.multi_reduction <add>, %109, %cst_32 [1] : vector<16x32xf32> to vector<16xf32>
    %111 = vector.shape_cast %110 : vector<16xf32> to vector<16x1xf32>
    %112 = math.sqrt %111 : vector<16x1xf32>
    %113 = arith.subf %104, %106 : vector<16x32xf32>
    %114 = arith.subf %104, %106 : vector<16x32xf32>
    %115 = arith.mulf %113, %114 : vector<16x32xf32>
    %cst_33 = arith.constant dense<0.000000e+00> : vector<16xf32>
    %116 = vector.multi_reduction <add>, %115, %cst_33 [1] : vector<16x32xf32> to vector<16xf32>
    %117 = vector.shape_cast %116 : vector<16xf32> to vector<16x1xf32>
    %118 = math.sqrt %117 : vector<16x1xf32>
    %119 = arith.subf %112, %118 : vector<16x1xf32>
    %cst_34 = arith.constant 1.000000e+00 : f32
    %120 = vector.broadcast %cst_34 : f32 to vector<16x1xf32>
    %121 = arith.cmpf olt, %119, %120 : vector<16x1xf32>
    %122 = arith.extui %121 : vector<16x1xi1> to vector<16x1xi32>
    %123 = arith.sitofp %122 : vector<16x1xi32> to vector<16x1xf32>
    %cst_35 = arith.constant 1.000000e+00 : f32
    %124 = vector.broadcast %cst_35 : f32 to vector<16x1xf32>
    %125 = arith.addf %119, %124 : vector<16x1xf32>
    %cst_36 = arith.constant 0.000000e+00 : f32
    %126 = vector.broadcast %cst_36 : f32 to vector<16x1xf32>
    %127 = arith.maximumf %125, %126 : vector<16x1xf32>
    %128 = arith.mulf %127, %123 : vector<16x1xf32>
    %129 = vector.extract_strided_slice %128 {offsets = [0, 0], sizes = [8, 1], strides = [1, 1]} : vector<16x1xf32> to vector<8x1xf32>
    %130 = vector.shape_cast %129 : vector<8x1xf32> to vector<1x8x1xf32>
    %cst_37 = arith.constant dense<0.000000e+00> : vector<1xf32>
    %131 = vector.multi_reduction <add>, %130, %cst_37 [1, 2] : vector<1x8x1xf32> to vector<1xf32>
    %132 = vector.shape_cast %131 : vector<1xf32> to vector<1x1x1xf32>
    %133 = vector.extract %132[0, 0, 0] : f32 from vector<1x1x1xf32>
    %134 = vector.extract_strided_slice %123 {offsets = [0, 0], sizes = [8, 1], strides = [1, 1]} : vector<16x1xf32> to vector<8x1xf32>
    %135 = vector.shape_cast %134 : vector<8x1xf32> to vector<1x8x1xf32>
    %cst_38 = arith.constant dense<0.000000e+00> : vector<1xf32>
    %136 = vector.multi_reduction <add>, %135, %cst_38 [1, 2] : vector<1x8x1xf32> to vector<1xf32>
    %137 = vector.shape_cast %136 : vector<1xf32> to vector<1x1x1xf32>
    %138 = vector.extract %137[0, 0, 0] : f32 from vector<1x1x1xf32>
    %139 = arith.divf %133, %138 : f32
    %140 = vector.extract_strided_slice %128 {offsets = [8, 0], sizes = [8, 1], strides = [1, 1]} : vector<16x1xf32> to vector<8x1xf32>
    %141 = vector.shape_cast %140 : vector<8x1xf32> to vector<1x8x1xf32>
    %cst_39 = arith.constant dense<0.000000e+00> : vector<1xf32>
    %142 = vector.multi_reduction <add>, %141, %cst_39 [1, 2] : vector<1x8x1xf32> to vector<1xf32>
    %143 = vector.shape_cast %142 : vector<1xf32> to vector<1x1x1xf32>
    %144 = vector.extract %143[0, 0, 0] : f32 from vector<1x1x1xf32>
    %145 = vector.extract_strided_slice %123 {offsets = [8, 0], sizes = [8, 1], strides = [1, 1]} : vector<16x1xf32> to vector<8x1xf32>
    %146 = vector.shape_cast %145 : vector<8x1xf32> to vector<1x8x1xf32>
    %cst_40 = arith.constant dense<0.000000e+00> : vector<1xf32>
    %147 = vector.multi_reduction <add>, %146, %cst_40 [1, 2] : vector<1x8x1xf32> to vector<1xf32>
    %148 = vector.shape_cast %147 : vector<1xf32> to vector<1x1x1xf32>
    %149 = vector.extract %148[0, 0, 0] : f32 from vector<1x1x1xf32>
    %150 = arith.divf %144, %149 : f32
    %151 = arith.addf %139, %150 : f32
    %152 = arith.addf %92, %151 : f32
    %153 = arith.addf %152, %50 : f32
    %c0_41 = arith.constant 0 : index
    %c0_42 = arith.constant 0 : index
    %154 = memref.load %arg4[%c0_41, %c0_42] : memref<1x1xf32, #tpu.memory_space<smem>>
    memref.store %153, %arg4[%c0_41, %c0_42] : memref<1x1xf32, #tpu.memory_space<smem>>
    return
  }
}

</mosaic_0001>

<bundles_post_ra>
// kernel: total_loss.1
= control target key start
LH: loop header
LB: loop body
LE: loop exit
PB: predicated region body
PF: predicated region fallthrough
CT: control target
= control target key end

     0   :  { %vm238_vm0 = vcmask 261120   ;;  %s715_s0 = inlined_call_operand.vmem [shape: s32[8,1], index: 0, kind: input, shape index: {}]   ;;  %s716_s1 = inlined_call_operand.vmem [shape: f32[24,256], index: 1, kind: input, shape index: {}]   ;;  %s717_s2 = inlined_call_operand.vmem [shape: f32[24,2], index: 2, kind: input, shape index: {}]   ;;  %s718_s3 = inlined_call_operand.vmem [shape: f32[48,32], index: 3, kind: input, shape index: {}]   ;;  %s719_s4 = inlined_call_operand.hbm [shape: f32[1,1], index: 4, kind: output, shape index: {}]  }
   0x1   :  { %v230_v0 = vld [vmem:[%s718_s3 + $0x20] sm:$0xff]  ;;  %v228_v2 = vld [vmem:[%s718_s3 + $0x10] sm:$0xff]  ;;  %v548_v6 = vld [vmem:[%s718_s3 + $0x8] sm:$0xff] }
   0x2   :  { %v226_v1 = vld [vmem:[%s718_s3] sm:$0xff]  ;;  %v236_v3 = vmul.f32 %v230_v0, %v230_v0  ;;  %v234_v5 = vmul.f32 %v228_v2, %v228_v2  ;;  %v233_v7 = vmul.f32 %v548_v6, %v548_v6  ;;  %v555_v8 = vld [vmem:[%s718_s3 + $0x28] sm:$0xff]  ;;  %v560_v9 = vld [vmem:[%s718_s3 + $0x18] sm:$0xff] }
   0x3   :  { %v232_v4 = vmul.f32 %v226_v1, %v226_v1 }
   0x4   :  { %v251_v10 = vsel %vm238_vm0, %v236_v3, 0.0 }
   0x5   :  { %v239_v11 = vsel %vm238_vm0, %v232_v4, 0.0 }
   0x6   :  { %9 = vsyncpa [#allocation3], 0  ;;  %252 = vadd.xlane.f32.xlu1 %v251_v10  ;;  %240 = vadd.xlane.f32.xlu0 %v239_v11  ;;  %v245_v12 = vsel %vm238_vm0, %v234_v5, 0.0  ;;  %v242_v13 = vsel %vm238_vm0, %v233_v7, 0.0  ;;  %v237_v14 = vmul.f32 %v555_v8, %v555_v8  ;;  %v235_v15 = vmul.f32 %v560_v9, %v560_v9  ;;  %v575_v18 = vld [vmem:[%s717_s2 + $0x8] sm:$0xff]  ;;  %s507_s28 = smov 127  }
   0x7   :  { %v581_v19 = vld [vmem:[%s717_s2 + $0x10] sm:$0xff]  ;;  %v586_v20 = vld [vmem:[%s717_s2] sm:$0xff]  ;;  %v47_v31 = vld [vmem:[%s716_s1 + $0x8] sm:$0xff]  ;;  %v508_v4 = vmov 0.0   ;;  %vm25_vm9 = vcmask 7168   ;;  %s509_s22 = smov 1.0  }
   0x8   :  { %v254_v16 = vsel %vm238_vm0, %v237_v14, 0.0  ;;  %v248_v17 = vsel %vm238_vm0, %v235_v15, 0.0  ;;  %v46_v30 = vld [vmem:[%s716_s1] sm:$0xff]  ;;  %v53_v37 = vmul.f32 %v47_v31, %v47_v31  ;;  %v51_v42 = vld [vmem:[%s716_s1 + $0x28] sm:$0xff]  ;;  %v48_v44 = vld [vmem:[%s716_s1 + $0x10] sm:$0xff] }
   0x9   :  { %v52_v36 = vmul.f32 %v46_v30, %v46_v30  ;;  %v50_v41 = vld [vmem:[%s716_s1 + $0x20] sm:$0xff]  ;;  %v49_v45 = vld [vmem:[%s716_s1 + $0x18] sm:$0xff]  ;;  %v57_v52 = vmul.f32 %v51_v42, %v51_v42  ;;  %v54_v55 = vmul.f32 %v48_v44, %v48_v44 }
   0xa   :  { %246 = vadd.xlane.f32.xlu0 %v245_v12  ;;  %243 = vadd.xlane.f32.xlu1 %v242_v13  ;;  %v56_v51 = vmul.f32 %v50_v41, %v50_v41  ;;  %v55_v56 = vmul.f32 %v49_v45, %v49_v45  ;;  %v18_v58 = vld [vmem:[%s715_s0] sm:$0xff] }
   0xb   :  { %v58_v50 = vadd.f32 %v53_v37, %v52_v36  ;;  %vm22_vm7 = vcmp.eq.s32.totalorder %v18_v58, 1  ;;  %vm19_vm8 = vcmp.eq.s32.totalorder %v18_v58, 0 }
   0xc   :  { %v618_v5 = vsel %vm22_vm7, 1.0, %v508_v4  ;;  %v621_v7 = vsel %vm19_vm8, 1.0, %v508_v4 }
   0xd   :  { %v26_v10 = vsel %vm25_vm9, %v621_v7, 0.0 }
   0xe   :  { %255 = vadd.xlane.f32.xlu1 %v254_v16  ;;  %249 = vadd.xlane.f32.xlu0 %v248_v17 }
  0x1f   :  { %126 = vrot.lane.b32.xlu1 %v575_v18, %s507_s28 }
  0x23   :  { %128 = vrot.lane.b32.xlu1 %v581_v19, %s507_s28 }
  0x24   :  { %124 = vrot.lane.b32.xlu0 %v586_v20, %s507_s28 }
  0x93   :  { %v253_v21 = vpop.xlane.xlu1 %252  ;;  %v241_v22 = vpop.xlane.xlu0 %240 }
  0x94   :  { %451 = vrsqrt.f32 %v253_v21  ;;  %vm267_vm1 = vcmp.gt.f32.partialorder %v253_v21, 1e-10  ;;  %vm263_vm2 = vcmp.gt.f32.partialorder %v241_v22, 1e-10 }
  0x95   :  { %453 = vrsqrt.f32 %v241_v22 }
  0x97   :  { %v247_v23 = vpop.xlane.xlu0 %246  ;;  %v244_v24 = vpop.xlane.xlu1 %243 }
  0x98   :  { %455 = vrsqrt.f32 %v247_v23  ;;  %vm265_vm3 = vcmp.gt.f32.partialorder %v247_v23, 1e-10  ;;  %vm264_vm4 = vcmp.gt.f32.partialorder %v244_v24, 1e-10 }
  0x99   :  { %457 = vrsqrt.f32 %v244_v24 }
  0x9b   :  { %v256_v25 = vpop.xlane.xlu1 %255  ;;  %v250_v26 = vpop.xlane.xlu0 %249 }
  0x9c   :  { %459 = vrsqrt.f32 %v256_v25  ;;  %vm268_vm5 = vcmp.gt.f32.partialorder %v256_v25, 1e-10  ;;  %vm266_vm6 = vcmp.gt.f32.partialorder %v250_v26, 1e-10 }
  0x9d   :  { %461 = vrsqrt.f32 %v250_v26 }
  0x9e   :  { %v452_v27 = vpop.eup %451 }
  0x9f   :  { %v454_v28 = vpop.eup %453  ;;  %v273_v29 = vsel %vm267_vm1, %v452_v27, 100000.0  ;;  %v629_v14 = vpop.permute.xlu1 %126 }
  0xa0   :  { %v279_v32 = vmul.f32 %v273_v29, %v230_v0  ;;  %v269_v33 = vsel %vm263_vm2, %v454_v28, 100000.0  ;;  %v631_v15 = vpop.permute.xlu0 %124  ;;  %v137_v16 = vsub.f32 %v575_v18, %v629_v14 }
  0xa1   :  { %v275_v34 = vmul.f32 %v269_v33, %v226_v1  ;;  %v64_v1 = vadd.f32 %v57_v52, %v56_v51  ;;  %v136_v17 = vsub.f32 %v586_v20, %v631_v15 }
  0xa2   :  { %v456_v35 = vpop.eup %455  ;;  %v140_v22 = vand.u32 2147483647, %v137_v16 }
  0xa3   :  { %v458_v38 = vpop.eup %457  ;;  %v271_v39 = vsel %vm265_vm3, %v456_v35, 100000.0  ;;  %v305_v40 = vsub.f32 %v275_v34, %v279_v32  ;;  %v637_v21 = vpop.permute.xlu1 %128  ;;  %v139_v23 = vand.u32 2147483647, %v136_v17 }
  0xa4   :  { %v277_v43 = vmul.f32 %v271_v39, %v228_v2  ;;  %v270_v47 = vsel %vm264_vm4, %v458_v38, 100000.0  ;;  %v61_v2 = vadd.f32 %v55_v56, %v54_v55  ;;  %v138_v24 = vsub.f32 %v581_v19, %v637_v21 }
  0xa5   :  { %v307_v46 = vmul.f32 %v305_v40, %v305_v40  ;;  %v276_v60 = vmul.f32 %v270_v47, %v548_v6  ;;  %v143_v25 = vsub.f32 0.0, %v140_v22  ;;  %v142_v26 = vsub.f32 0.0, %v139_v23 }
  0xa6   :  { %v460_v48 = vpop.eup %459  ;;  %v281_v49 = vsub.f32 %v275_v34, %v277_v43  ;;  %v141_v27 = vand.u32 2147483647, %v138_v24  ;;  %v133_v55 = vmax.f32 %v586_v20, %v631_v15 }
  0xa7   :  { %v462_v53 = vpop.eup %461  ;;  %v309_v54 = vsel %vm238_vm0, %v307_v46, 0.0  ;;  %v274_v57 = vsel %vm268_vm5, %v460_v48, 100000.0  ;;  %v147_v28 = vmul.f32 1.442695, %v143_v25  ;;  %v145_v29 = vmul.f32 1.442695, %v142_v26 }
  0xa8   :  { %310 = vadd.xlane.f32.xlu0 %v309_v54  ;;  %v283_v59 = vmul.f32 %v281_v49, %v281_v49  ;;  %v280_v61 = vmul.f32 %v274_v57, %v555_v8  ;;  %v272_v62 = vsel %vm266_vm6, %v462_v53, 100000.0  ;;  %v36_v8 = vsel %vm25_vm9, %v618_v5, 0.0 }
  0xa9   :  { %v278_v63 = vmul.f32 %v272_v62, %v560_v9  ;;  %v144_v30 = vsub.f32 0.0, %v141_v27  ;;  %463 = vpow2.f32 %v147_v28  ;;  %v134_v54 = vmax.f32 %v575_v18, %v629_v14 }
  0xaa   :  { %v285_v0 = vsel %vm238_vm0, %v283_v59, 0.0  ;;  %v306_v3 = vsub.f32 %v276_v60, %v280_v61  ;;  %465 = vpow2.f32 %v145_v29  ;;  %v135_v62 = vmax.f32 %v581_v19, %v637_v21 }
  0xab   :  { %286 = vadd.xlane.f32.xlu1 %v285_v0  ;;  %v282_v6 = vsub.f32 %v276_v60, %v278_v63  ;;  %v149_v31 = vmul.f32 1.442695, %v144_v30 }
  0xac   :  { %59 = vadd.xlane.f32.xlu0 %v58_v50  ;;  %v308_v9 = vmul.f32 %v306_v3, %v306_v3 }
  0xad   :  { %v284_v11 = vmul.f32 %v282_v6, %v282_v6  ;;  %467 = vpow2.f32 %v149_v31 }
  0xae   :  { %v312_v12 = vsel %vm238_vm0, %v308_v9, 0.0 }
  0xaf   :  { %65 = vadd.xlane.f32.xlu1 %v64_v1  ;;  %v288_v13 = vsel %vm238_vm0, %v284_v11, 0.0 }
  0xb0   :  { %62 = vadd.xlane.f32.xlu0 %v61_v2 }
  0xb3   :  { %37 = vadd.xlane.f32.xlu1 %v36_v8  ;;  %v464_v32 = vpop.eup %463 }
  0xb4   :  { %27 = vadd.xlane.f32.xlu0 %v26_v10  ;;  %v466_v33 = vpop.eup %465  ;;  %v160_v34 = vadd.f32 1.0, %v464_v32  ;;  %v163_v38 = vmul.f32 -0.5, %v464_v32  ;;  %v166_v45 = vand.u32 2147483647, %v464_v32 }
  0xb5   :  { %v151_v35 = vadd.f32 1.0, %v466_v33  ;;  %v154_v39 = vmul.f32 -0.5, %v466_v33  ;;  %v157_v46 = vand.u32 2147483647, %v466_v33 }
  0xb6   :  { %469 = vlog2.f32 %v160_v34  ;;  %v164_v40 = vadd.f32 1.0, %v163_v38  ;;  %vm167_vm10 = vcmp.lt.f32.partialorder %v166_v45, 0.0004427343 }
  0xb7   :  { %313 = vadd.xlane.f32.xlu1 %v312_v12  ;;  %v468_v36 = vpop.eup %467  ;;  %471 = vlog2.f32 %v151_v35  ;;  %v155_v42 = vadd.f32 1.0, %v154_v39  ;;  %vm158_vm11 = vcmp.lt.f32.partialorder %v157_v46, 0.0004427343 }
  0xb8   :  { %289 = vadd.xlane.f32.xlu0 %v288_v13  ;;  %v169_v37 = vadd.f32 1.0, %v468_v36  ;;  %v172_v43 = vmul.f32 -0.5, %v468_v36  ;;  %v165_v47 = vmul.f32 %v464_v32, %v164_v40  ;;  %v175_v53 = vand.u32 2147483647, %v468_v36 }
  0xb9   :  { %v156_v50 = vmul.f32 %v466_v33, %v155_v42 }
  0xba   :  { %473 = vlog2.f32 %v169_v37  ;;  %v173_v51 = vadd.f32 1.0, %v172_v43  ;;  %vm176_vm12 = vcmp.lt.f32.partialorder %v175_v53, 0.0004427343 }
  0xbc   :  { %v174_v59 = vmul.f32 %v468_v36, %v173_v51 }
  0xc0   :  { %v470_v41 = vpop.eup %469 }
  0xc1   :  { %v472_v44 = vpop.eup %471  ;;  %v162_v48 = vmul.f32 0.6931472, %v470_v41 }
  0xc2   :  { %v153_v49 = vmul.f32 0.6931472, %v472_v44 }
  0xc3   :  { %v168_v56 = vsel %vm167_vm10, %v165_v47, %v162_v48 }
  0xc4   :  { %v474_v52 = vpop.eup %473  ;;  %v159_v57 = vsel %vm158_vm11, %v156_v50, %v153_v49  ;;  %v179_v60 = vadd.f32 %v168_v56, %v134_v54 }
  0xc5   :  { %v171_v58 = vmul.f32 0.6931472, %v474_v52  ;;  %v178_v61 = vadd.f32 %v159_v57, %v133_v55 }
  0xc6   :  { %v182_v0 = vsub.f32 %v179_v60, %v575_v18  ;;  %v185_v2 = vsub.f32 %v179_v60, %v629_v14 }
  0xc7   :  { %v177_v63 = vsel %vm176_vm12, %v174_v59, %v171_v58  ;;  %v181_v1 = vsub.f32 %v178_v61, %v586_v20  ;;  %v184_v3 = vsub.f32 %v178_v61, %v631_v15 }
  0xc8   :  { %v180_v6 = vadd.f32 %v177_v63, %v135_v62 }
  0xc9   :  { %v187_v10 = vadd.f32 %v182_v0, %v181_v1  ;;  %v200_v11 = vadd.f32 %v185_v2, %v184_v3 }
  0xca   :  { %v186_v9 = vsub.f32 %v180_v6, %v637_v21  ;;  %v183_v12 = vsub.f32 %v180_v6, %v581_v19 }
  0xcc   :  { %v188_v17 = vadd.f32 %v187_v10, %v186_v9  ;;  %v201_v20 = vadd.f32 %v200_v11, %v183_v12 }
  0xce   :  { %v189_v24 = vmul.f32 %v621_v7, %v188_v17  ;;  %v202_v25 = vmul.f32 %v618_v5, %v201_v20 }
  0xd0   :  { %v190_v32 = vsel %vm25_vm9, %v189_v24, 0.0  ;;  %v203_v35 = vsel %vm25_vm9, %v202_v25, 0.0 }
 0x135   :  { %v311_v8 = vpop.xlane.xlu0 %310 }
 0x136   :  { %475 = vrsqrt.f32 %v311_v8  ;;  %vm317_vm13 = vcmp.eq.f32.partialorder %v311_v8, inf  ;;  %vm319_vm14 = vcmp.eq.f32.partialorder %v311_v8, 0.0  ;;  %v320_v37 = vand.u32 2147483648, %v311_v8 }
 0x138   :  { %v287_v13 = vpop.xlane.xlu1 %286 }
 0x139   :  { %477 = vrsqrt.f32 %v287_v13  ;;  %v60_v16 = vpop.xlane.xlu0 %59  ;;  %vm293_vm15 = vcmp.eq.f32.partialorder %v287_v13, inf  ;;  %v296_v40 = vand.u32 2147483648, %v287_v13  ;;  %vm295_vm0 = vcmp.eq.f32.partialorder %v287_v13, 0.0 }
 0x13a   :  { %v67_v18 = vmul.f32 %v621_v7, %v60_v16 }
 0x13c   :  { %v66_v22 = vpop.xlane.xlu1 %65  ;;  %v68_v14 = vsel %vm25_vm9, %v67_v18, 0.0 }
 0x13d   :  { %v89_v15 = vmul.f32 %v618_v5, %v66_v22  ;;  %v63_v23 = vpop.xlane.xlu0 %62  ;;  %69 = vadd.xlane.f32.xlu0 %v68_v14 }
 0x13e   :  { %v78_v21 = vmul.f32 %v621_v7, %v63_v23 }
 0x13f   :  { %v90_v19 = vsel %vm25_vm9, %v89_v15, 0.0 }
 0x140   :  { %v476_v26 = vpop.eup %475  ;;  %v79_v27 = vsel %vm25_vm9, %v78_v21, 0.0  ;;  %v38_v28 = vpop.xlane.xlu1 %37 }
 0x141   :  { %v316_v29 = vmul.f32 %v476_v26, %v311_v8  ;;  %80 = vadd.xlane.f32.xlu1 %v79_v27  ;;  %91 = vadd.xlane.f32.xlu0 %v90_v19  ;;  %v39_v30 = vrot.slane %v38_v28, 4  ;;  %v28_v31 = vpop.xlane.xlu0 %27 }
 0x142   :  { %v29_v33 = vrot.slane %v28_v31, 4 }
 0x143   :  { %v478_v34 = vpop.eup %477  ;;  %v40_v7 = vadd.f32 %v39_v30, %v38_v28  ;;  %v318_v5 = vsel %vm317_vm13, %v311_v8, %v316_v29 }
 0x144   :  { %v292_v36 = vmul.f32 %v478_v34, %v287_v13  ;;  %v30_v38 = vadd.f32 %v29_v33, %v28_v31  ;;  %v314_v39 = vpop.xlane.xlu1 %313  ;;  %v321_v46 = vsel %vm319_vm14, %v320_v37, %v318_v5 }
 0x145   :  { %191 = vadd.xlane.f32.xlu1 %v190_v32  ;;  %204 = vadd.xlane.f32.xlu0 %v203_v35  ;;  %v41_v41 = vrot.slane %v40_v7, 2  ;;  %479 = vrsqrt.f32 %v314_v39  ;;  %v290_v42 = vpop.xlane.xlu0 %289  ;;  %vm324_vm2 = vcmp.eq.f32.partialorder %v314_v39, inf  ;;  %vm326_vm3 = vcmp.eq.f32.partialorder %v314_v39, 0.0 }
 0x146   :  { %v294_v43 = vsel %vm293_vm15, %v287_v13, %v292_v36  ;;  %v31_v44 = vrot.slane %v30_v38, 2  ;;  %481 = vrsqrt.f32 %v290_v42  ;;  %v327_v60 = vand.u32 2147483648, %v314_v39 }
 0x147   :  { %v297_v45 = vsel %vm295_vm0, %v296_v40, %v294_v43  ;;  %v42_v49 = vadd.f32 %v41_v41, %v40_v7  ;;  %vm300_vm4 = vcmp.eq.f32.partialorder %v290_v42, inf  ;;  %v303_v0 = vand.u32 2147483648, %v290_v42 }
 0x148   :  { %v329_v47 = vsub.f32 %v297_v45, %v321_v46  ;;  %v32_v48 = vadd.f32 %v31_v44, %v30_v38  ;;  %vm302_vm5 = vcmp.eq.f32.partialorder %v290_v42, 0.0 }
 0x149   :  { %v43_v52 = vrot.slane %v42_v49, 1 }
 0x14a   :  { %vm331_vm1 = vcmp.lt.f32.partialorder %v329_v47, 1.0  ;;  %v337_v50 = vadd.f32 1.0, %v329_v47  ;;  %v33_v51 = vrot.slane %v32_v48, 1 }
 0x14b   :  { %v411_v53 = vsel %vm331_vm1, 1.0, %v508_v4  ;;  %v44_v57 = vadd.f32 %v43_v52, %v42_v49 }
 0x14c   :  { %v353_v54 = vsel %vm25_vm9, %v411_v53, 0.0  ;;  %v339_v55 = vmax.f32 %v337_v50, 0.0  ;;  %v34_v56 = vadd.f32 %v33_v51, %v32_v48 }
 0x14d   :  { %354 = vadd.xlane.f32.xlu0 %v353_v54 }
 0x14e   :  { %v341_v58 = vmul.f32 %v411_v53, %v339_v55  ;;  %413 = vpush %v34_v56 }
 0x14f   :  { %v480_v59 = vpop.eup %479  ;;  %415 = vpush %v44_v57 }
 0x150   :  { %v482_v61 = vpop.eup %481  ;;  %v343_v62 = vsel %vm25_vm9, %v341_v58, 0.0  ;;  %v323_v63 = vmul.f32 %v480_v59, %v314_v39 }
 0x151   :  { %344 = vadd.xlane.f32.xlu1 %v343_v62  ;;  %v299_v1 = vmul.f32 %v482_v61, %v290_v42 }
 0x152   :  { %v325_v2 = vsel %vm324_vm2, %v314_v39, %v323_v63 }
 0x153   :  { %v301_v3 = vsel %vm300_vm4, %v290_v42, %v299_v1  ;;  %v328_v6 = vsel %vm326_vm3, %v327_v60, %v325_v2 }
 0x154   :  { %v304_v8 = vsel %vm302_vm5, %v303_v0, %v301_v3 }
 0x155   :  { %v330_v9 = vsub.f32 %v304_v8, %v328_v6 }
 0x157   :  { %vm332_vm6 = vcmp.lt.f32.partialorder %v330_v9, 1.0  ;;  %v338_v10 = vadd.f32 1.0, %v330_v9 }
 0x158   :  { %v412_v11 = vsel %vm332_vm6, 1.0, %v508_v4 }
 0x159   :  { %v377_v12 = vsel %vm25_vm9, %v412_v11, 0.0  ;;  %v340_v13 = vmax.f32 %v338_v10, 0.0 }
 0x15a   :  { %378 = vadd.xlane.f32.xlu0 %v377_v12 }
 0x15b   :  { %v342_v16 = vmul.f32 %v412_v11, %v340_v13 }
 0x15d   :  { %v367_v18 = vsel %vm25_vm9, %v342_v16, 0.0 }
 0x15e   :  { %368 = vadd.xlane.f32.xlu1 %v367_v18 }
 0x17f   :  { %s670_s0 = spop %413 }
 0x180   :  { %s672_s1 = spop %415  ;;  %s110_s20 = smul.f32 256.0, %s670_s0 }
 0x181   :  { %s101_s21 = smul.f32 256.0, %s672_s1  ;;  %s213_s25 = smax.f32 %s509_s22, %s670_s0 }
 0x182   :  { %s111_s23 = smax.f32 %s509_s22, %s110_s20  ;;  %s219_s26 = smax.f32 %s509_s22, %s672_s1  ;;  %v214_v25 = vstv %s213_s25 }
 0x183   :  { %s102_s24 = smax.f32 %s509_s22, %s101_s21  ;;  %v112_v22 = vstv %s111_s23  ;;  %v220_v29 = vstv %s219_s26  ;;  %p108_p0 = scmp.gt.f32.partialorder %s670_s0, 0.0 }
 0x184   :  { %v103_v23 = vstv %s102_s24  ;;  %483 = vrcp.f32 %v112_v22  ;;  %p100_p1 = scmp.gt.f32.partialorder %s672_s1, 0.0  ;;  %s495_s26 = scalar_lea.hbm %s719_s4, 16 }
 0x185   :  { %485 = vrcp.f32 %v103_v23  ;;  %p496_p2 = scmp.ne.s32.totalorder %s719_s4, %s495_s26  ;;  %p499_p3 = scmp.lt.u32.totalorder %s495_s26, %s719_s4 }
 0x186   :  { %487 = vrcp.f32 %v214_v25 }
 0x187   :  { %489 = vrcp.f32 %v220_v29  ;;  %p501_p4 = pnand %p499_p3, %p496_p2 }
 0x18e   :  { %v484_v49 = vpop.eup %483 }
 0x18f   :  { %v486_v53 = vpop.eup %485 }
 0x190   :  { %v488_v57 = vpop.eup %487 }
 0x191   :  { %v490_v61 = vpop.eup %489 }
 0x1ca   :  { %v70_v17 = vpop.xlane.xlu0 %69 }
 0x1cb   :  { %v71_v4 = vrot.slane %v70_v17, 4 }
 0x1cd   :  { %v72_v20 = vadd.f32 %v71_v4, %v70_v17 }
 0x1ce   :  { %v81_v14 = vpop.xlane.xlu1 %80  ;;  %v92_v15 = vpop.xlane.xlu0 %91 }
 0x1cf   :  { %v73_v21 = vrot.slane %v72_v20, 2  ;;  %v82_v24 = vrot.slane %v81_v14, 4  ;;  %v93_v19 = vrot.slane %v92_v15, 4 }
 0x1d1   :  { %v83_v26 = vadd.f32 %v82_v24, %v81_v14  ;;  %v94_v27 = vadd.f32 %v93_v19, %v92_v15  ;;  %v74_v28 = vadd.f32 %v73_v21, %v72_v20 }
 0x1d2   :  { %v192_v30 = vpop.xlane.xlu1 %191  ;;  %v205_v31 = vpop.xlane.xlu0 %204 }
 0x1d3   :  { %v84_v32 = vrot.slane %v83_v26, 2  ;;  %v95_v33 = vrot.slane %v94_v27, 2  ;;  %v193_v34 = vrot.slane %v192_v30, 4  ;;  %v206_v35 = vrot.slane %v205_v31, 4 }
 0x1d4   :  { %v75_v7 = vrot.slane %v74_v28, 1 }
 0x1d5   :  { %v194_v36 = vadd.f32 %v193_v34, %v192_v30  ;;  %v207_v5 = vadd.f32 %v206_v35, %v205_v31  ;;  %v85_v37 = vadd.f32 %v84_v32, %v83_v26  ;;  %v96_v38 = vadd.f32 %v95_v33, %v94_v27 }
 0x1d6   :  { %v76_v39 = vadd.f32 %v75_v7, %v74_v28 }
 0x1d7   :  { %v195_v40 = vrot.slane %v194_v36, 2  ;;  %v208_v41 = vrot.slane %v207_v5, 2  ;;  %v86_v42 = vrot.slane %v85_v37, 1  ;;  %v97_v43 = vrot.slane %v96_v38, 1 }
 0x1d8   :  { %417 = vpush %v76_v39 }
 0x1d9   :  { %v87_v44 = vadd.f32 %v86_v42, %v85_v37  ;;  %v98_v45 = vadd.f32 %v97_v43, %v96_v38  ;;  %v196_v46 = vadd.f32 %v195_v40, %v194_v36  ;;  %v209_v47 = vadd.f32 %v208_v41, %v207_v5 }
 0x1da   :  { %v355_v48 = vpop.xlane.xlu0 %354 }
 0x1db   :  { %419 = vpush %v87_v44  ;;  %v356_v50 = vrot.slane %v355_v48, 4  ;;  %v197_v51 = vrot.slane %v196_v46, 1  ;;  %v210_v52 = vrot.slane %v209_v47, 1 }
 0x1dc   :  { %421 = vpush %v98_v45 }
 0x1dd   :  { %423 = vpush %v486_v53  ;;  %v357_v54 = vadd.f32 %v356_v50, %v355_v48  ;;  %v198_v55 = vadd.f32 %v197_v51, %v196_v46  ;;  %v211_v56 = vadd.f32 %v210_v52, %v209_v47 }
 0x1de   :  { %425 = vpush %v484_v49  ;;  %v345_v58 = vpop.xlane.xlu1 %344 }
 0x1df   :  { %v358_v59 = vrot.slane %v357_v54, 2  ;;  %v346_v60 = vrot.slane %v345_v58, 4  ;;  %427 = vpush %v198_v55 }
 0x1e0   :  { %429 = vpush %v211_v56 }
 0x1e1   :  { %v347_v62 = vadd.f32 %v346_v60, %v345_v58  ;;  %431 = vpush %v488_v57  ;;  %v359_v63 = vadd.f32 %v358_v59, %v357_v54 }
 0x1e2   :  { %433 = vpush %v490_v61 }
 0x1e3   :  { %v348_v0 = vrot.slane %v347_v62, 2  ;;  %v360_v2 = vrot.slane %v359_v63, 1 }
 0x1e5   :  { %v349_v1 = vadd.f32 %v348_v0, %v347_v62  ;;  %v361_v8 = vadd.f32 %v360_v2, %v359_v63 }
 0x1e7   :  { %v350_v3 = vrot.slane %v349_v1, 1  ;;  %v379_v10 = vpop.xlane.xlu0 %378 }
 0x1e8   :  { %v380_v12 = vrot.slane %v379_v10, 4 }
 0x1e9   :  { %v351_v6 = vadd.f32 %v350_v3, %v349_v1 }
 0x1ea   :  { %v381_v16 = vadd.f32 %v380_v12, %v379_v10 }
 0x1eb   :  { %435 = vpush %v351_v6  ;;  %v369_v9 = vpop.xlane.xlu1 %368 }
 0x1ec   :  { %437 = vpush %v361_v8  ;;  %v370_v11 = vrot.slane %v369_v9, 4  ;;  %v382_v17 = vrot.slane %v381_v16, 2 }
 0x1ee   :  { %v371_v13 = vadd.f32 %v370_v11, %v369_v9  ;;  %v383_v22 = vadd.f32 %v382_v17, %v381_v16 }
 0x1f0   :  { %v372_v18 = vrot.slane %v371_v13, 2  ;;  %v384_v15 = vrot.slane %v383_v22, 1 }
 0x1f2   :  { %v373_v20 = vadd.f32 %v372_v18, %v371_v13  ;;  %v385_v24 = vadd.f32 %v384_v15, %v383_v22 }
 0x1f4   :  { %v374_v14 = vrot.slane %v373_v20, 1 }
 0x1f6   :  { %v375_v21 = vadd.f32 %v374_v14, %v373_v20 }
 0x209   :  { %s418_s3 = spop %417 }
 0x20c   :  { %s420_s27 = spop %419 }
 0x20d   :  { %s109_s28 = sadd.f32 %s420_s27, %s418_s3  ;;  %s422_s29 = spop %421 }
 0x20e   :  { %s424_s30 = spop %423 }
 0x20f   :  { %s106_s5 = smul.f32 %s424_s30, %s422_s29  ;;  %s426_s6 = spop %425 }
 0x210   :  { %s115_s2 = smul.f32 %s426_s6, %s109_s28  ;;  %s428_s7 = spop %427 }
 0x211   :  { %s721_s5 = smov (!%p100_p1, %s106_s5), 0.0  ;;  %s430_s8 = spop %429 }
 0x212   :  { %s723_s2 = smov (!%p108_p0, %s115_s2), 0.0  ;;  %s432_s9 = spop %431 }
 0x213   :  { %s117_s10 = sadd.f32 %s723_s2, %s721_s5  ;;  %s217_s11 = smul.f32 %s432_s9, %s428_s7 }
 0x214   :  { %s434_s12 = spop %433 }
 0x215   :  { %s223_s13 = smul.f32 %s434_s12, %s430_s8  ;;  %s725_s11 = smov (!%p108_p0, %s217_s11), 0.0 }
 0x217   :  { %s727_s13 = smov (!%p100_p1, %s223_s13), 0.0 }
 0x218   :  { %s225_s14 = sadd.f32 %s727_s13, %s725_s11 }
 0x21c   :  { %s436_s15 = spop %435 }
 0x21d   :  { %s438_s16 = spop %437 }
 0x21e   :  { %v363_v4 = vstv %s438_s16 }
 0x21f   :  { %491 = vrcp.f32 %v363_v4 }
 0x229   :  { %v492_v23 = vpop.eup %491 }
 0x22a   :  { %439 = vpush %v492_v23 }
 0x22b   :  { %441 = vpush %v375_v21 }
 0x22c   :  { %443 = vpush %v385_v24 }
 0x25b   :  { %s440_s17 = spop %439 }
 0x25c   :  { %s442_s18 = spop %441  ;;  %s366_s0 = smul.f32 %s440_s17, %s436_s15 }
 0x25d   :  { %s444_s19 = spop %443 }
 0x25e   :  { %v387_v19 = vstv %s444_s19 }
 0x25f   :  { %493 = vrcp.f32 %v387_v19 }
 0x269   :  { %v494_v25 = vpop.eup %493 }
 0x26a   :  { %445 = vpush %v494_v25 }
 0x29b   :  { %s446_s1 = spop %445 }
 0x29c   :  { %s390_s20 = smul.f32 %s446_s1, %s442_s18 }
 0x29e   :  { %s391_s21 = sadd.f32 %s390_s20, %s366_s0 }
 0x2a0   :  { %s392_s22 = sadd.f32 %s391_s21, %s225_s14 }
 0x2a2   :  { %s393_s23 = sadd.f32 %s392_s22, %s117_s10 }
 0x2a4   :  { %395 = sst [smem:[#allocation2]] %s393_s23 }
 0x2a5   :  { %504 = shalt.err (!%p501_p4)
}
 0x2a6   :  { %s510_s30 = smov [#allocation2]  }
 0x2a7   :  { %403 = dma.smem_to_hbm %s510_s30, 16, %s719_s4, [#allocation3]  }
 0x2a8   :  { %505 = dma.done.wait [#allocation3], 16  }
 0x2a9   :  { %506 = vsyncadd [#allocation3], 4294967280 }
 0x2aa   :  { %407 = sfence }
 0x2ab   :  { %408 = vsyncpa [#allocation3], 1 }

</bundles_post_ra>
